<compile_context>
chip_gen: v7x
topology: tpu7x:2x2x1
jax: 0.10.0
libtpu: 0.0.40
codegen_flags: <defaults>
</compile_context>

<pallas_src>
import jax
import jax.numpy as jnp
from jax.experimental import pallas as pl
from jax.experimental.pallas import tpu as pltpu


def _make_fused_lstm_kernel(seq_len, batch_pad, hidden, num_layers):
    """Build the fused wavefront kernel for static (T, Bp, H, L)."""
    T, Bp, H, L = seq_len, batch_pad, hidden, num_layers
    G = 4 * H

    def kernel(x_ref, w0_ref, wf_ref, bias_ref, out_ref):
        # ---- hoisted constants (outside all loops) ------------------------
        # Per-lane scale/offset implementing the single-tanh gate trick:
        #   g-gate lanes   [2H:3H]: tanh(x)            -> sc=1.0, off=0.0
        #   i/f/o lanes             : sigmoid(x) = 0.5*tanh(0.5*x)+0.5
        lane = jax.lax.broadcasted_iota(jnp.int32, (Bp, G), 1)
        is_g = (lane >= 2 * H) & (lane < 3 * H)
        sc = jnp.where(is_g, 1.0, 0.5).astype(jnp.float32)
        off = jnp.where(is_g, 0.0, 0.5).astype(jnp.float32)

        bias = bias_ref[...]                       # (Bp, L*G), all layers
        wf = wf_ref[...]                           # (L*H, L*G)

        # Hoisted layer-0 input projection (bias added via `bias` per step).
        gx0 = jnp.dot(x_ref[...], w0_ref[...],
                      preferred_element_type=jnp.float32)    # (T*Bp, G)

        h_state = [jnp.zeros((Bp, H), jnp.float32) for _ in range(L)]
        c_state = [jnp.zeros((Bp, H), jnp.float32) for _ in range(L)]
        outs = []

        # ---- wavefront over (layer, time): T + L - 1 serial steps ---------
        for s in range(T + L - 1):
            h_cat = (h_state[0] if L == 1
                     else jnp.concatenate(h_state, axis=1))   # (Bp, L*H)
            # One fused recurrent matmul for all layers this step.
            fused = jnp.dot(h_cat, wf,
                            preferred_element_type=jnp.float32) + bias

            for l in range(L):
                t = s - l
                if t < 0 or t >= T:
                    continue                       # layer inactive this step
                gates = fused[:, l * G:(l + 1) * G]            # vreg-aligned
                if l == 0:
                    # 8-row-aligned static slice of the hoisted projection.
                    gates = gates + gx0[t * Bp:(t + 1) * Bp, :]
                # Single tanh pass over the whole (Bp, 4H) gate tile.
                act = jnp.tanh(gates * sc) * sc + off
                i_g = act[:, 0 * H:1 * H]
                f_g = act[:, 1 * H:2 * H]
                g_g = act[:, 2 * H:3 * H]
                o_g = act[:, 3 * H:4 * H]
                c_new = f_g * c_state[l] + i_g * g_g
                h_new = o_g * jnp.tanh(c_new)
                c_state[l] = c_new
                h_state[l] = h_new
                if l == L - 1:
                    outs.append(h_new)             # time order t = 0..T-1

        # Single lane-dense store: (Bp, T*H), last dim multiple of 128.
        out_ref[...] = jnp.concatenate(outs, axis=1)

    return kernel


def fused_lstm_pallas(x_bft, params):
    """x_bft: (B, F, T) -> y: (B, H, T).  params: [(w_ih, w_hh, b_ih, b_hh)]."""
    B, F, T = x_bft.shape
    L = len(params)
    H = params[0][1].shape[1]                      # w_hh: (4H, H)
    G = 4 * H
    Bp = max(8, ((B + 7) // 8) * 8)                # sublane-aligned batch pad

    # (B, F, T) -> (T, B, F) -> zero-pad batch to Bp -> (T*Bp, F): each
    # timestep's rows start on an 8-row (f32 tile) boundary.
    x_tbf = jnp.transpose(x_bft, (2, 0, 1)).astype(jnp.float32)
    x_pad = jnp.zeros((T, Bp, F), jnp.float32).at[:, :B, :].set(x_tbf)
    x2d = x_pad.reshape(T * Bp, F)

    # Layer-0 input projection weight (transposed to (F, 4H)).
    w0 = jnp.transpose(params[0][0]).astype(jnp.float32)

    # Fused wavefront weight (L*H, L*4H):
    #   column block l <- rows l*H:(l+1)*H   : w_hh_l^T
    #                      rows (l-1)*H:l*H  : w_ih_l^T   (l >= 1)
    wf = jnp.zeros((L * H, L * G), jnp.float32)
    for l, (w_ih, w_hh, _, _) in enumerate(params):
        wf = wf.at[l * H:(l + 1) * H, l * G:(l + 1) * G].set(
            jnp.transpose(w_hh).astype(jnp.float32))
        if l > 0:
            wf = wf.at[(l - 1) * H:l * H, l * G:(l + 1) * G].set(
                jnp.transpose(w_ih).astype(jnp.float32))

    # Fused per-layer biases, tiled to a full sublane block (Bp, L*4H).
    bias = jnp.concatenate(
        [(b_ih + b_hh).astype(jnp.float32) for (_, _, b_ih, b_hh) in params])
    bias = jnp.tile(bias.reshape(1, L * G), (Bp, 1))

    vmem = pl.BlockSpec(memory_space=pltpu.MemorySpace.VMEM)
    y2d = pl.pallas_call(
        _make_fused_lstm_kernel(T, Bp, H, L),
        out_shape=jax.ShapeDtypeStruct((Bp, T * H), jnp.float32),
        in_specs=[vmem] * 4,
        out_specs=vmem,
    )(x2d, w0, wf, bias)

    # (Bp, T*H) -> (B, T, H) -> (B, H, T)
    return jnp.transpose(y2d[:B].reshape(B, T, H), (0, 2, 1))


@jax.jit
def net_forward(x_bft, params):
    """Equivalent of Net.forward (eval mode). x: (B, feat, seq) -> (B, hidden, seq)."""
    return fused_lstm_pallas(x_bft, params)


def init_lstm_params(key, feat_size, hidden_size, num_layers):
    """PyTorch-style uniform(-1/sqrt(H), 1/sqrt(H)) init, deterministic."""
    k = 1.0 / jnp.sqrt(jnp.float32(hidden_size))
    params = []
    for layer in range(num_layers):
        in_size = feat_size if layer == 0 else hidden_size
        key, k1, k2, k3, k4 = jax.random.split(key, 5)
        w_ih = jax.random.uniform(k1, (4 * hidden_size, in_size),
                                  jnp.float32, -k, k)
        w_hh = jax.random.uniform(k2, (4 * hidden_size, hidden_size),
                                  jnp.float32, -k, k)
        b_ih = jax.random.uniform(k3, (4 * hidden_size,), jnp.float32, -k, k)
        b_hh = jax.random.uniform(k4, (4 * hidden_size,), jnp.float32, -k, k)
        params.append((w_ih, w_hh, b_ih, b_hh))
    return params


def lstm_reference(x_bft, params, num_layers):
    """Pure-JAX reference (PyTorch gate order: i, f, g, o)."""
    x = jnp.transpose(x_bft, (0, 2, 1))            # (B, T, F)
    B, T, _ = x.shape
    for layer in range(num_layers):
        w_ih, w_hh, b_ih, b_hh = params[layer]
        H = w_hh.shape[1]
        h = jnp.zeros((B, H), jnp.float32)
        c = jnp.zeros((B, H), jnp.float32)
        outs = []
        for t in range(T):
            g = x[:, t, :] @ w_ih.T + h @ w_hh.T + b_ih + b_hh
            i_g = jax.nn.sigmoid(g[:, 0 * H:1 * H])
            f_g = jax.nn.sigmoid(g[:, 1 * H:2 * H])
            g_g = jnp.tanh(g[:, 2 * H:3 * H])
            o_g = jax.nn.sigmoid(g[:, 3 * H:4 * H])
            c = f_g * c + i_g * g_g
            h = o_g * jnp.tanh(c)
            outs.append(h)
        x = jnp.stack(outs, axis=1)                # (B, T, H)
    return jnp.transpose(x, (0, 2, 1))             # (B, H, T)


if __name__ == "__main__":
    # Shapes consistent with the module: Net(sequence_length=8, feat_size=32,
    # num_layer=2); input x is (batch, feat, seq).
    B, FEAT, SEQ, NUM_LAYERS = 2, 32, 8, 2

    key = jax.random.PRNGKey(0)
    key, kx = jax.random.split(key)
    x = jax.random.normal(kx, (B, FEAT, SEQ), jnp.float32)
    params = init_lstm_params(key, FEAT, FEAT, NUM_LAYERS)

    y = net_forward(x, params)
    y = jax.block_until_ready(y)
    assert y.shape == (B, FEAT, SEQ), y.shape

    y_ref = lstm_reference(x, params, NUM_LAYERS)
    max_err = float(jnp.max(jnp.abs(y - y_ref)))
    assert jnp.allclose(y, y_ref, atol=1e-3, rtol=1e-3), max_err

    print("KERNEL_OK")
</pallas_src>

<mosaic_0001>
module attributes {stable_mosaic.version = 11 : i64} {
  func.func @kernel(%arg0: memref<64x32xf32, #tpu.memory_space<vmem>>, %arg1: memref<32x128xf32, #tpu.memory_space<vmem>>, %arg2: memref<64x256xf32, #tpu.memory_space<vmem>>, %arg3: memref<8x256xf32, #tpu.memory_space<vmem>>, %arg4: memref<8x256xf32, #tpu.memory_space<vmem>>) attributes {dimension_semantics = [], scalar_prefetch = 0 : i64, scratch_operands = 0 : i64, tpu.core_type = #tpu.core_type<tc>} {
    %0 = tpu.iota {dimensions = array<i32: 1>} : vector<8x128xi32>
    %c64_i32 = arith.constant 64 : i32
    %1 = vector.broadcast %c64_i32 : i32 to vector<8x128xi32>
    %2 = arith.cmpi sge, %0, %1 : vector<8x128xi32>
    %c96_i32 = arith.constant 96 : i32
    %3 = vector.broadcast %c96_i32 : i32 to vector<8x128xi32>
    %4 = arith.cmpi slt, %0, %3 : vector<8x128xi32>
    %5 = arith.andi %2, %4 : vector<8x128xi1>
    %cst = arith.constant 1.000000e+00 : f32
    %cst_0 = arith.constant 5.000000e-01 : f32
    %6 = vector.broadcast %cst : f32 to vector<8x128xf32>
    %7 = vector.broadcast %cst_0 : f32 to vector<8x128xf32>
    %8 = arith.select %5, %6, %7 : vector<8x128xi1>, vector<8x128xf32>
    %cst_1 = arith.constant 0.000000e+00 : f32
    %cst_2 = arith.constant 5.000000e-01 : f32
    %9 = vector.broadcast %cst_1 : f32 to vector<8x128xf32>
    %10 = vector.broadcast %cst_2 : f32 to vector<8x128xf32>
    %11 = arith.select %5, %9, %10 : vector<8x128xi1>, vector<8x128xf32>
    %c0 = arith.constant 0 : index
    %c0_3 = arith.constant 0 : index
    %12 = vector.load %arg3[%c0, %c0_3] : memref<8x256xf32, #tpu.memory_space<vmem>>, vector<8x256xf32>
    %c0_4 = arith.constant 0 : index
    %c0_5 = arith.constant 0 : index
    %13 = vector.load %arg2[%c0_4, %c0_5] : memref<64x256xf32, #tpu.memory_space<vmem>>, vector<64x256xf32>
    %c0_6 = arith.constant 0 : index
    %c0_7 = arith.constant 0 : index
    %14 = vector.load %arg0[%c0_6, %c0_7] : memref<64x32xf32, #tpu.memory_space<vmem>>, vector<64x32xf32>
    %c0_8 = arith.constant 0 : index
    %c0_9 = arith.constant 0 : index
    %15 = vector.load %arg1[%c0_8, %c0_9] : memref<32x128xf32, #tpu.memory_space<vmem>>, vector<32x128xf32>
    %cst_10 = arith.constant dense<0.000000e+00> : vector<64x128xf32>
    %16 = tpu.matmul %14, %15, %cst_10 {dimension_numbers = #tpu.dot_dimension_numbers<[1], [0], [0], [1], [0, 0, 1, 1], [], []>} : vector<64x32xf32>, vector<32x128xf32>, vector<64x128xf32> -> vector<64x128xf32>
    %cst_11 = arith.constant 0.000000e+00 : f32
    %17 = vector.broadcast %cst_11 : f32 to vector<8x32xf32>
    %cst_12 = arith.constant 0.000000e+00 : f32
    %18 = vector.broadcast %cst_12 : f32 to vector<8x32xf32>
    %cst_13 = arith.constant 0.000000e+00 : f32
    %19 = vector.broadcast %cst_13 : f32 to vector<8x32xf32>
    %cst_14 = arith.constant 0.000000e+00 : f32
    %20 = vector.broadcast %cst_14 : f32 to vector<8x32xf32>
    %21 = tpu.concatenate %17, %18 in 1 : vector<8x32xf32>, vector<8x32xf32> -> vector<8x64xf32>
    %cst_15 = arith.constant dense<0.000000e+00> : vector<8x256xf32>
    %22 = tpu.matmul %21, %13, %cst_15 {dimension_numbers = #tpu.dot_dimension_numbers<[1], [0], [0], [1], [0, 0, 1, 1], [], []>} : vector<8x64xf32>, vector<64x256xf32>, vector<8x256xf32> -> vector<8x256xf32>
    %23 = arith.addf %22, %12 : vector<8x256xf32>
    %24 = vector.extract_strided_slice %23 {offsets = [0, 0], sizes = [8, 128], strides = [1, 1]} : vector<8x256xf32> to vector<8x128xf32>
    %25 = vector.extract_strided_slice %16 {offsets = [0, 0], sizes = [8, 128], strides = [1, 1]} : vector<64x128xf32> to vector<8x128xf32>
    %26 = arith.addf %24, %25 : vector<8x128xf32>
    %27 = arith.mulf %26, %8 : vector<8x128xf32>
    %28 = math.tanh %27 : vector<8x128xf32>
    %29 = arith.mulf %28, %8 : vector<8x128xf32>
    %30 = arith.addf %29, %11 : vector<8x128xf32>
    %31 = vector.extract_strided_slice %30 {offsets = [0, 0], sizes = [8, 32], strides = [1, 1]} : vector<8x128xf32> to vector<8x32xf32>
    %32 = vector.extract_strided_slice %30 {offsets = [0, 32], sizes = [8, 32], strides = [1, 1]} : vector<8x128xf32> to vector<8x32xf32>
    %33 = vector.extract_strided_slice %30 {offsets = [0, 64], sizes = [8, 32], strides = [1, 1]} : vector<8x128xf32> to vector<8x32xf32>
    %34 = vector.extract_strided_slice %30 {offsets = [0, 96], sizes = [8, 32], strides = [1, 1]} : vector<8x128xf32> to vector<8x32xf32>
    %35 = arith.mulf %32, %19 : vector<8x32xf32>
    %36 = arith.mulf %31, %33 : vector<8x32xf32>
    %37 = arith.addf %35, %36 : vector<8x32xf32>
    %38 = math.tanh %37 : vector<8x32xf32>
    %39 = arith.mulf %34, %38 : vector<8x32xf32>
    %40 = tpu.concatenate %39, %18 in 1 : vector<8x32xf32>, vector<8x32xf32> -> vector<8x64xf32>
    %cst_16 = arith.constant dense<0.000000e+00> : vector<8x256xf32>
    %41 = tpu.matmul %40, %13, %cst_16 {dimension_numbers = #tpu.dot_dimension_numbers<[1], [0], [0], [1], [0, 0, 1, 1], [], []>} : vector<8x64xf32>, vector<64x256xf32>, vector<8x256xf32> -> vector<8x256xf32>
    %42 = arith.addf %41, %12 : vector<8x256xf32>
    %43 = vector.extract_strided_slice %42 {offsets = [0, 0], sizes = [8, 128], strides = [1, 1]} : vector<8x256xf32> to vector<8x128xf32>
    %44 = vector.extract_strided_slice %16 {offsets = [8, 0], sizes = [8, 128], strides = [1, 1]} : vector<64x128xf32> to vector<8x128xf32>
    %45 = arith.addf %43, %44 : vector<8x128xf32>
    %46 = arith.mulf %45, %8 : vector<8x128xf32>
    %47 = math.tanh %46 : vector<8x128xf32>
    %48 = arith.mulf %47, %8 : vector<8x128xf32>
    %49 = arith.addf %48, %11 : vector<8x128xf32>
    %50 = vector.extract_strided_slice %49 {offsets = [0, 0], sizes = [8, 32], strides = [1, 1]} : vector<8x128xf32> to vector<8x32xf32>
    %51 = vector.extract_strided_slice %49 {offsets = [0, 32], sizes = [8, 32], strides = [1, 1]} : vector<8x128xf32> to vector<8x32xf32>
    %52 = vector.extract_strided_slice %49 {offsets = [0, 64], sizes = [8, 32], strides = [1, 1]} : vector<8x128xf32> to vector<8x32xf32>
    %53 = vector.extract_strided_slice %49 {offsets = [0, 96], sizes = [8, 32], strides = [1, 1]} : vector<8x128xf32> to vector<8x32xf32>
    %54 = arith.mulf %51, %37 : vector<8x32xf32>
    %55 = arith.mulf %50, %52 : vector<8x32xf32>
    %56 = arith.addf %54, %55 : vector<8x32xf32>
    %57 = math.tanh %56 : vector<8x32xf32>
    %58 = arith.mulf %53, %57 : vector<8x32xf32>
    %59 = vector.extract_strided_slice %42 {offsets = [0, 128], sizes = [8, 128], strides = [1, 1]} : vector<8x256xf32> to vector<8x128xf32>
    %60 = arith.mulf %59, %8 : vector<8x128xf32>
    %61 = math.tanh %60 : vector<8x128xf32>
    %62 = arith.mulf %61, %8 : vector<8x128xf32>
    %63 = arith.addf %62, %11 : vector<8x128xf32>
    %64 = vector.extract_strided_slice %63 {offsets = [0, 0], sizes = [8, 32], strides = [1, 1]} : vector<8x128xf32> to vector<8x32xf32>
    %65 = vector.extract_strided_slice %63 {offsets = [0, 32], sizes = [8, 32], strides = [1, 1]} : vector<8x128xf32> to vector<8x32xf32>
    %66 = vector.extract_strided_slice %63 {offsets = [0, 64], sizes = [8, 32], strides = [1, 1]} : vector<8x128xf32> to vector<8x32xf32>
    %67 = vector.extract_strided_slice %63 {offsets = [0, 96], sizes = [8, 32], strides = [1, 1]} : vector<8x128xf32> to vector<8x32xf32>
    %68 = arith.mulf %65, %20 : vector<8x32xf32>
    %69 = arith.mulf %64, %66 : vector<8x32xf32>
    %70 = arith.addf %68, %69 : vector<8x32xf32>
    %71 = math.tanh %70 : vector<8x32xf32>
    %72 = arith.mulf %67, %71 : vector<8x32xf32>
    %73 = tpu.concatenate %58, %72 in 1 : vector<8x32xf32>, vector<8x32xf32> -> vector<8x64xf32>
    %cst_17 = arith.constant dense<0.000000e+00> : vector<8x256xf32>
    %74 = tpu.matmul %73, %13, %cst_17 {dimension_numbers = #tpu.dot_dimension_numbers<[1], [0], [0], [1], [0, 0, 1, 1], [], []>} : vector<8x64xf32>, vector<64x256xf32>, vector<8x256xf32> -> vector<8x256xf32>
    %75 = arith.addf %74, %12 : vector<8x256xf32>
    %76 = vector.extract_strided_slice %75 {offsets = [0, 0], sizes = [8, 128], strides = [1, 1]} : vector<8x256xf32> to vector<8x128xf32>
    %77 = vector.extract_strided_slice %16 {offsets = [16, 0], sizes = [8, 128], strides = [1, 1]} : vector<64x128xf32> to vector<8x128xf32>
    %78 = arith.addf %76, %77 : vector<8x128xf32>
    %79 = arith.mulf %78, %8 : vector<8x128xf32>
    %80 = math.tanh %79 : vector<8x128xf32>
    %81 = arith.mulf %80, %8 : vector<8x128xf32>
    %82 = arith.addf %81, %11 : vector<8x128xf32>
    %83 = vector.extract_strided_slice %82 {offsets = [0, 0], sizes = [8, 32], strides = [1, 1]} : vector<8x128xf32> to vector<8x32xf32>
    %84 = vector.extract_strided_slice %82 {offsets = [0, 32], sizes = [8, 32], strides = [1, 1]} : vector<8x128xf32> to vector<8x32xf32>
    %85 = vector.extract_strided_slice %82 {offsets = [0, 64], sizes = [8, 32], strides = [1, 1]} : vector<8x128xf32> to vector<8x32xf32>
    %86 = vector.extract_strided_slice %82 {offsets = [0, 96], sizes = [8, 32], strides = [1, 1]} : vector<8x128xf32> to vector<8x32xf32>
    %87 = arith.mulf %84, %56 : vector<8x32xf32>
    %88 = arith.mulf %83, %85 : vector<8x32xf32>
    %89 = arith.addf %87, %88 : vector<8x32xf32>
    %90 = math.tanh %89 : vector<8x32xf32>
    %91 = arith.mulf %86, %90 : vector<8x32xf32>
    %92 = vector.extract_strided_slice %75 {offsets = [0, 128], sizes = [8, 128], strides = [1, 1]} : vector<8x256xf32> to vector<8x128xf32>
    %93 = arith.mulf %92, %8 : vector<8x128xf32>
    %94 = math.tanh %93 : vector<8x128xf32>
    %95 = arith.mulf %94, %8 : vector<8x128xf32>
    %96 = arith.addf %95, %11 : vector<8x128xf32>
    %97 = vector.extract_strided_slice %96 {offsets = [0, 0], sizes = [8, 32], strides = [1, 1]} : vector<8x128xf32> to vector<8x32xf32>
    %98 = vector.extract_strided_slice %96 {offsets = [0, 32], sizes = [8, 32], strides = [1, 1]} : vector<8x128xf32> to vector<8x32xf32>
    %99 = vector.extract_strided_slice %96 {offsets = [0, 64], sizes = [8, 32], strides = [1, 1]} : vector<8x128xf32> to vector<8x32xf32>
    %100 = vector.extract_strided_slice %96 {offsets = [0, 96], sizes = [8, 32], strides = [1, 1]} : vector<8x128xf32> to vector<8x32xf32>
    %101 = arith.mulf %98, %70 : vector<8x32xf32>
    %102 = arith.mulf %97, %99 : vector<8x32xf32>
    %103 = arith.addf %101, %102 : vector<8x32xf32>
    %104 = math.tanh %103 : vector<8x32xf32>
    %105 = arith.mulf %100, %104 : vector<8x32xf32>
    %106 = tpu.concatenate %91, %105 in 1 : vector<8x32xf32>, vector<8x32xf32> -> vector<8x64xf32>
    %cst_18 = arith.constant dense<0.000000e+00> : vector<8x256xf32>
    %107 = tpu.matmul %106, %13, %cst_18 {dimension_numbers = #tpu.dot_dimension_numbers<[1], [0], [0], [1], [0, 0, 1, 1], [], []>} : vector<8x64xf32>, vector<64x256xf32>, vector<8x256xf32> -> vector<8x256xf32>
    %108 = arith.addf %107, %12 : vector<8x256xf32>
    %109 = vector.extract_strided_slice %108 {offsets = [0, 0], sizes = [8, 128], strides = [1, 1]} : vector<8x256xf32> to vector<8x128xf32>
    %110 = vector.extract_strided_slice %16 {offsets = [24, 0], sizes = [8, 128], strides = [1, 1]} : vector<64x128xf32> to vector<8x128xf32>
    %111 = arith.addf %109, %110 : vector<8x128xf32>
    %112 = arith.mulf %111, %8 : vector<8x128xf32>
    %113 = math.tanh %112 : vector<8x128xf32>
    %114 = arith.mulf %113, %8 : vector<8x128xf32>
    %115 = arith.addf %114, %11 : vector<8x128xf32>
    %116 = vector.extract_strided_slice %115 {offsets = [0, 0], sizes = [8, 32], strides = [1, 1]} : vector<8x128xf32> to vector<8x32xf32>
    %117 = vector.extract_strided_slice %115 {offsets = [0, 32], sizes = [8, 32], strides = [1, 1]} : vector<8x128xf32> to vector<8x32xf32>
    %118 = vector.extract_strided_slice %115 {offsets = [0, 64], sizes = [8, 32], strides = [1, 1]} : vector<8x128xf32> to vector<8x32xf32>
    %119 = vector.extract_strided_slice %115 {offsets = [0, 96], sizes = [8, 32], strides = [1, 1]} : vector<8x128xf32> to vector<8x32xf32>
    %120 = arith.mulf %117, %89 : vector<8x32xf32>
    %121 = arith.mulf %116, %118 : vector<8x32xf32>
    %122 = arith.addf %120, %121 : vector<8x32xf32>
    %123 = math.tanh %122 : vector<8x32xf32>
    %124 = arith.mulf %119, %123 : vector<8x32xf32>
    %125 = vector.extract_strided_slice %108 {offsets = [0, 128], sizes = [8, 128], strides = [1, 1]} : vector<8x256xf32> to vector<8x128xf32>
    %126 = arith.mulf %125, %8 : vector<8x128xf32>
    %127 = math.tanh %126 : vector<8x128xf32>
    %128 = arith.mulf %127, %8 : vector<8x128xf32>
    %129 = arith.addf %128, %11 : vector<8x128xf32>
    %130 = vector.extract_strided_slice %129 {offsets = [0, 0], sizes = [8, 32], strides = [1, 1]} : vector<8x128xf32> to vector<8x32xf32>
    %131 = vector.extract_strided_slice %129 {offsets = [0, 32], sizes = [8, 32], strides = [1, 1]} : vector<8x128xf32> to vector<8x32xf32>
    %132 = vector.extract_strided_slice %129 {offsets = [0, 64], sizes = [8, 32], strides = [1, 1]} : vector<8x128xf32> to vector<8x32xf32>
    %133 = vector.extract_strided_slice %129 {offsets = [0, 96], sizes = [8, 32], strides = [1, 1]} : vector<8x128xf32> to vector<8x32xf32>
    %134 = arith.mulf %131, %103 : vector<8x32xf32>
    %135 = arith.mulf %130, %132 : vector<8x32xf32>
    %136 = arith.addf %134, %135 : vector<8x32xf32>
    %137 = math.tanh %136 : vector<8x32xf32>
    %138 = arith.mulf %133, %137 : vector<8x32xf32>
    %139 = tpu.concatenate %124, %138 in 1 : vector<8x32xf32>, vector<8x32xf32> -> vector<8x64xf32>
    %cst_19 = arith.constant dense<0.000000e+00> : vector<8x256xf32>
    %140 = tpu.matmul %139, %13, %cst_19 {dimension_numbers = #tpu.dot_dimension_numbers<[1], [0], [0], [1], [0, 0, 1, 1], [], []>} : vector<8x64xf32>, vector<64x256xf32>, vector<8x256xf32> -> vector<8x256xf32>
    %141 = arith.addf %140, %12 : vector<8x256xf32>
    %142 = vector.extract_strided_slice %141 {offsets = [0, 0], sizes = [8, 128], strides = [1, 1]} : vector<8x256xf32> to vector<8x128xf32>
    %143 = vector.extract_strided_slice %16 {offsets = [32, 0], sizes = [8, 128], strides = [1, 1]} : vector<64x128xf32> to vector<8x128xf32>
    %144 = arith.addf %142, %143 : vector<8x128xf32>
    %145 = arith.mulf %144, %8 : vector<8x128xf32>
    %146 = math.tanh %145 : vector<8x128xf32>
    %147 = arith.mulf %146, %8 : vector<8x128xf32>
    %148 = arith.addf %147, %11 : vector<8x128xf32>
    %149 = vector.extract_strided_slice %148 {offsets = [0, 0], sizes = [8, 32], strides = [1, 1]} : vector<8x128xf32> to vector<8x32xf32>
    %150 = vector.extract_strided_slice %148 {offsets = [0, 32], sizes = [8, 32], strides = [1, 1]} : vector<8x128xf32> to vector<8x32xf32>
    %151 = vector.extract_strided_slice %148 {offsets = [0, 64], sizes = [8, 32], strides = [1, 1]} : vector<8x128xf32> to vector<8x32xf32>
    %152 = vector.extract_strided_slice %148 {offsets = [0, 96], sizes = [8, 32], strides = [1, 1]} : vector<8x128xf32> to vector<8x32xf32>
    %153 = arith.mulf %150, %122 : vector<8x32xf32>
    %154 = arith.mulf %149, %151 : vector<8x32xf32>
    %155 = arith.addf %153, %154 : vector<8x32xf32>
    %156 = math.tanh %155 : vector<8x32xf32>
    %157 = arith.mulf %152, %156 : vector<8x32xf32>
    %158 = vector.extract_strided_slice %141 {offsets = [0, 128], sizes = [8, 128], strides = [1, 1]} : vector<8x256xf32> to vector<8x128xf32>
    %159 = arith.mulf %158, %8 : vector<8x128xf32>
    %160 = math.tanh %159 : vector<8x128xf32>
    %161 = arith.mulf %160, %8 : vector<8x128xf32>
    %162 = arith.addf %161, %11 : vector<8x128xf32>
    %163 = vector.extract_strided_slice %162 {offsets = [0, 0], sizes = [8, 32], strides = [1, 1]} : vector<8x128xf32> to vector<8x32xf32>
    %164 = vector.extract_strided_slice %162 {offsets = [0, 32], sizes = [8, 32], strides = [1, 1]} : vector<8x128xf32> to vector<8x32xf32>
    %165 = vector.extract_strided_slice %162 {offsets = [0, 64], sizes = [8, 32], strides = [1, 1]} : vector<8x128xf32> to vector<8x32xf32>
    %166 = vector.extract_strided_slice %162 {offsets = [0, 96], sizes = [8, 32], strides = [1, 1]} : vector<8x128xf32> to vector<8x32xf32>
    %167 = arith.mulf %164, %136 : vector<8x32xf32>
    %168 = arith.mulf %163, %165 : vector<8x32xf32>
    %169 = arith.addf %167, %168 : vector<8x32xf32>
    %170 = math.tanh %169 : vector<8x32xf32>
    %171 = arith.mulf %166, %170 : vector<8x32xf32>
    %172 = tpu.concatenate %157, %171 in 1 : vector<8x32xf32>, vector<8x32xf32> -> vector<8x64xf32>
    %cst_20 = arith.constant dense<0.000000e+00> : vector<8x256xf32>
    %173 = tpu.matmul %172, %13, %cst_20 {dimension_numbers = #tpu.dot_dimension_numbers<[1], [0], [0], [1], [0, 0, 1, 1], [], []>} : vector<8x64xf32>, vector<64x256xf32>, vector<8x256xf32> -> vector<8x256xf32>
    %174 = arith.addf %173, %12 : vector<8x256xf32>
    %175 = vector.extract_strided_slice %174 {offsets = [0, 0], sizes = [8, 128], strides = [1, 1]} : vector<8x256xf32> to vector<8x128xf32>
    %176 = vector.extract_strided_slice %16 {offsets = [40, 0], sizes = [8, 128], strides = [1, 1]} : vector<64x128xf32> to vector<8x128xf32>
    %177 = arith.addf %175, %176 : vector<8x128xf32>
    %178 = arith.mulf %177, %8 : vector<8x128xf32>
    %179 = math.tanh %178 : vector<8x128xf32>
    %180 = arith.mulf %179, %8 : vector<8x128xf32>
    %181 = arith.addf %180, %11 : vector<8x128xf32>
    %182 = vector.extract_strided_slice %181 {offsets = [0, 0], sizes = [8, 32], strides = [1, 1]} : vector<8x128xf32> to vector<8x32xf32>
    %183 = vector.extract_strided_slice %181 {offsets = [0, 32], sizes = [8, 32], strides = [1, 1]} : vector<8x128xf32> to vector<8x32xf32>
    %184 = vector.extract_strided_slice %181 {offsets = [0, 64], sizes = [8, 32], strides = [1, 1]} : vector<8x128xf32> to vector<8x32xf32>
    %185 = vector.extract_strided_slice %181 {offsets = [0, 96], sizes = [8, 32], strides = [1, 1]} : vector<8x128xf32> to vector<8x32xf32>
    %186 = arith.mulf %183, %155 : vector<8x32xf32>
    %187 = arith.mulf %182, %184 : vector<8x32xf32>
    %188 = arith.addf %186, %187 : vector<8x32xf32>
    %189 = math.tanh %188 : vector<8x32xf32>
    %190 = arith.mulf %185, %189 : vector<8x32xf32>
    %191 = vector.extract_strided_slice %174 {offsets = [0, 128], sizes = [8, 128], strides = [1, 1]} : vector<8x256xf32> to vector<8x128xf32>
    %192 = arith.mulf %191, %8 : vector<8x128xf32>
    %193 = math.tanh %192 : vector<8x128xf32>
    %194 = arith.mulf %193, %8 : vector<8x128xf32>
    %195 = arith.addf %194, %11 : vector<8x128xf32>
    %196 = vector.extract_strided_slice %195 {offsets = [0, 0], sizes = [8, 32], strides = [1, 1]} : vector<8x128xf32> to vector<8x32xf32>
    %197 = vector.extract_strided_slice %195 {offsets = [0, 32], sizes = [8, 32], strides = [1, 1]} : vector<8x128xf32> to vector<8x32xf32>
    %198 = vector.extract_strided_slice %195 {offsets = [0, 64], sizes = [8, 32], strides = [1, 1]} : vector<8x128xf32> to vector<8x32xf32>
    %199 = vector.extract_strided_slice %195 {offsets = [0, 96], sizes = [8, 32], strides = [1, 1]} : vector<8x128xf32> to vector<8x32xf32>
    %200 = arith.mulf %197, %169 : vector<8x32xf32>
    %201 = arith.mulf %196, %198 : vector<8x32xf32>
    %202 = arith.addf %200, %201 : vector<8x32xf32>
    %203 = math.tanh %202 : vector<8x32xf32>
    %204 = arith.mulf %199, %203 : vector<8x32xf32>
    %205 = tpu.concatenate %190, %204 in 1 : vector<8x32xf32>, vector<8x32xf32> -> vector<8x64xf32>
    %cst_21 = arith.constant dense<0.000000e+00> : vector<8x256xf32>
    %206 = tpu.matmul %205, %13, %cst_21 {dimension_numbers = #tpu.dot_dimension_numbers<[1], [0], [0], [1], [0, 0, 1, 1], [], []>} : vector<8x64xf32>, vector<64x256xf32>, vector<8x256xf32> -> vector<8x256xf32>
    %207 = arith.addf %206, %12 : vector<8x256xf32>
    %208 = vector.extract_strided_slice %207 {offsets = [0, 0], sizes = [8, 128], strides = [1, 1]} : vector<8x256xf32> to vector<8x128xf32>
    %209 = vector.extract_strided_slice %16 {offsets = [48, 0], sizes = [8, 128], strides = [1, 1]} : vector<64x128xf32> to vector<8x128xf32>
    %210 = arith.addf %208, %209 : vector<8x128xf32>
    %211 = arith.mulf %210, %8 : vector<8x128xf32>
    %212 = math.tanh %211 : vector<8x128xf32>
    %213 = arith.mulf %212, %8 : vector<8x128xf32>
    %214 = arith.addf %213, %11 : vector<8x128xf32>
    %215 = vector.extract_strided_slice %214 {offsets = [0, 0], sizes = [8, 32], strides = [1, 1]} : vector<8x128xf32> to vector<8x32xf32>
    %216 = vector.extract_strided_slice %214 {offsets = [0, 32], sizes = [8, 32], strides = [1, 1]} : vector<8x128xf32> to vector<8x32xf32>
    %217 = vector.extract_strided_slice %214 {offsets = [0, 64], sizes = [8, 32], strides = [1, 1]} : vector<8x128xf32> to vector<8x32xf32>
    %218 = vector.extract_strided_slice %214 {offsets = [0, 96], sizes = [8, 32], strides = [1, 1]} : vector<8x128xf32> to vector<8x32xf32>
    %219 = arith.mulf %216, %188 : vector<8x32xf32>
    %220 = arith.mulf %215, %217 : vector<8x32xf32>
    %221 = arith.addf %219, %220 : vector<8x32xf32>
    %222 = math.tanh %221 : vector<8x32xf32>
    %223 = arith.mulf %218, %222 : vector<8x32xf32>
    %224 = vector.extract_strided_slice %207 {offsets = [0, 128], sizes = [8, 128], strides = [1, 1]} : vector<8x256xf32> to vector<8x128xf32>
    %225 = arith.mulf %224, %8 : vector<8x128xf32>
    %226 = math.tanh %225 : vector<8x128xf32>
    %227 = arith.mulf %226, %8 : vector<8x128xf32>
    %228 = arith.addf %227, %11 : vector<8x128xf32>
    %229 = vector.extract_strided_slice %228 {offsets = [0, 0], sizes = [8, 32], strides = [1, 1]} : vector<8x128xf32> to vector<8x32xf32>
    %230 = vector.extract_strided_slice %228 {offsets = [0, 32], sizes = [8, 32], strides = [1, 1]} : vector<8x128xf32> to vector<8x32xf32>
    %231 = vector.extract_strided_slice %228 {offsets = [0, 64], sizes = [8, 32], strides = [1, 1]} : vector<8x128xf32> to vector<8x32xf32>
    %232 = vector.extract_strided_slice %228 {offsets = [0, 96], sizes = [8, 32], strides = [1, 1]} : vector<8x128xf32> to vector<8x32xf32>
    %233 = arith.mulf %230, %202 : vector<8x32xf32>
    %234 = arith.mulf %229, %231 : vector<8x32xf32>
    %235 = arith.addf %233, %234 : vector<8x32xf32>
    %236 = math.tanh %235 : vector<8x32xf32>
    %237 = arith.mulf %232, %236 : vector<8x32xf32>
    %238 = tpu.concatenate %223, %237 in 1 : vector<8x32xf32>, vector<8x32xf32> -> vector<8x64xf32>
    %cst_22 = arith.constant dense<0.000000e+00> : vector<8x256xf32>
    %239 = tpu.matmul %238, %13, %cst_22 {dimension_numbers = #tpu.dot_dimension_numbers<[1], [0], [0], [1], [0, 0, 1, 1], [], []>} : vector<8x64xf32>, vector<64x256xf32>, vector<8x256xf32> -> vector<8x256xf32>
    %240 = arith.addf %239, %12 : vector<8x256xf32>
    %241 = vector.extract_strided_slice %240 {offsets = [0, 0], sizes = [8, 128], strides = [1, 1]} : vector<8x256xf32> to vector<8x128xf32>
    %242 = vector.extract_strided_slice %16 {offsets = [56, 0], sizes = [8, 128], strides = [1, 1]} : vector<64x128xf32> to vector<8x128xf32>
    %243 = arith.addf %241, %242 : vector<8x128xf32>
    %244 = arith.mulf %243, %8 : vector<8x128xf32>
    %245 = math.tanh %244 : vector<8x128xf32>
    %246 = arith.mulf %245, %8 : vector<8x128xf32>
    %247 = arith.addf %246, %11 : vector<8x128xf32>
    %248 = vector.extract_strided_slice %247 {offsets = [0, 0], sizes = [8, 32], strides = [1, 1]} : vector<8x128xf32> to vector<8x32xf32>
    %249 = vector.extract_strided_slice %247 {offsets = [0, 32], sizes = [8, 32], strides = [1, 1]} : vector<8x128xf32> to vector<8x32xf32>
    %250 = vector.extract_strided_slice %247 {offsets = [0, 64], sizes = [8, 32], strides = [1, 1]} : vector<8x128xf32> to vector<8x32xf32>
    %251 = vector.extract_strided_slice %247 {offsets = [0, 96], sizes = [8, 32], strides = [1, 1]} : vector<8x128xf32> to vector<8x32xf32>
    %252 = arith.mulf %249, %221 : vector<8x32xf32>
    %253 = arith.mulf %248, %250 : vector<8x32xf32>
    %254 = arith.addf %252, %253 : vector<8x32xf32>
    %255 = math.tanh %254 : vector<8x32xf32>
    %256 = arith.mulf %251, %255 : vector<8x32xf32>
    %257 = vector.extract_strided_slice %240 {offsets = [0, 128], sizes = [8, 128], strides = [1, 1]} : vector<8x256xf32> to vector<8x128xf32>
    %258 = arith.mulf %257, %8 : vector<8x128xf32>
    %259 = math.tanh %258 : vector<8x128xf32>
    %260 = arith.mulf %259, %8 : vector<8x128xf32>
    %261 = arith.addf %260, %11 : vector<8x128xf32>
    %262 = vector.extract_strided_slice %261 {offsets = [0, 0], sizes = [8, 32], strides = [1, 1]} : vector<8x128xf32> to vector<8x32xf32>
    %263 = vector.extract_strided_slice %261 {offsets = [0, 32], sizes = [8, 32], strides = [1, 1]} : vector<8x128xf32> to vector<8x32xf32>
    %264 = vector.extract_strided_slice %261 {offsets = [0, 64], sizes = [8, 32], strides = [1, 1]} : vector<8x128xf32> to vector<8x32xf32>
    %265 = vector.extract_strided_slice %261 {offsets = [0, 96], sizes = [8, 32], strides = [1, 1]} : vector<8x128xf32> to vector<8x32xf32>
    %266 = arith.mulf %263, %235 : vector<8x32xf32>
    %267 = arith.mulf %262, %264 : vector<8x32xf32>
    %268 = arith.addf %266, %267 : vector<8x32xf32>
    %269 = math.tanh %268 : vector<8x32xf32>
    %270 = arith.mulf %265, %269 : vector<8x32xf32>
    %271 = tpu.concatenate %256, %270 in 1 : vector<8x32xf32>, vector<8x32xf32> -> vector<8x64xf32>
    %cst_23 = arith.constant dense<0.000000e+00> : vector<8x256xf32>
    %272 = tpu.matmul %271, %13, %cst_23 {dimension_numbers = #tpu.dot_dimension_numbers<[1], [0], [0], [1], [0, 0, 1, 1], [], []>} : vector<8x64xf32>, vector<64x256xf32>, vector<8x256xf32> -> vector<8x256xf32>
    %273 = arith.addf %272, %12 : vector<8x256xf32>
    %274 = vector.extract_strided_slice %273 {offsets = [0, 128], sizes = [8, 128], strides = [1, 1]} : vector<8x256xf32> to vector<8x128xf32>
    %275 = arith.mulf %274, %8 : vector<8x128xf32>
    %276 = math.tanh %275 : vector<8x128xf32>
    %277 = arith.mulf %276, %8 : vector<8x128xf32>
    %278 = arith.addf %277, %11 : vector<8x128xf32>
    %279 = vector.extract_strided_slice %278 {offsets = [0, 0], sizes = [8, 32], strides = [1, 1]} : vector<8x128xf32> to vector<8x32xf32>
    %280 = vector.extract_strided_slice %278 {offsets = [0, 32], sizes = [8, 32], strides = [1, 1]} : vector<8x128xf32> to vector<8x32xf32>
    %281 = vector.extract_strided_slice %278 {offsets = [0, 64], sizes = [8, 32], strides = [1, 1]} : vector<8x128xf32> to vector<8x32xf32>
    %282 = vector.extract_strided_slice %278 {offsets = [0, 96], sizes = [8, 32], strides = [1, 1]} : vector<8x128xf32> to vector<8x32xf32>
    %283 = arith.mulf %280, %268 : vector<8x32xf32>
    %284 = arith.mulf %279, %281 : vector<8x32xf32>
    %285 = arith.addf %283, %284 : vector<8x32xf32>
    %286 = math.tanh %285 : vector<8x32xf32>
    %287 = arith.mulf %282, %286 : vector<8x32xf32>
    %288 = tpu.concatenate %72, %105, %138, %171, %204, %237, %270, %287 in 1 : vector<8x32xf32>, vector<8x32xf32>, vector<8x32xf32>, vector<8x32xf32>, vector<8x32xf32>, vector<8x32xf32>, vector<8x32xf32>, vector<8x32xf32> -> vector<8x256xf32>
    %c0_24 = arith.constant 0 : index
    %c0_25 = arith.constant 0 : index
    %289 = vector.load %arg4[%c0_24, %c0_25] : memref<8x256xf32, #tpu.memory_space<vmem>>, vector<8x256xf32>
    tpu.vector_store %arg4[%c0_24, %c0_25], %288 {strides = array<i32>} : memref<8x256xf32, #tpu.memory_space<vmem>>, vector<8x256xf32>,
    return
  }
}

</mosaic_0001>

<bundles_post_ra>
// kernel: net_forward.1
= control target key start
LH: loop header
LB: loop body
LE: loop exit
PB: predicated region body
PF: predicated region fallthrough
CT: control target
= control target key end

     0   :  { %v1555_v3 = vmov 0.0   ;;  %vm54_vm0 = vcmask 261120   ;;  %v17_v33 = vlaneseq  ;;  %v1556_v41 = vmov 0.5   ;;  %s1557_s7 = smov 64   ;;  %s1558_s8 = smov 32   ;;  %s1995_s2 = inlined_call_operand.vmem [shape: f32[64,256], index: 2, kind: input, shape index: {}]   ;;  %s1996_s1 = inlined_call_operand.vmem [shape: f32[32,128], index: 1, kind: input, shape index: {}]   ;;  %s1997_s0 = inlined_call_operand.vmem [shape: f32[64,32], index: 0, kind: input, shape index: {}]   ;;  %s1998_s3 = inlined_call_operand.vmem [shape: f32[8,256], index: 3, kind: input, shape index: {}]   ;;  %s1999_s4 = inlined_call_operand.vmem [shape: f32[8,256], index: 4, kind: output, shape index: {}]  }
   0x1   :  { %v27_v0 = vld [vmem:[%s1995_s2 + $0x8] sm:$0xff]  ;;  %v29_v1 = vld [vmem:[%s1995_s2 + $0x18] sm:$0xff]  ;;  %v26_v2 = vld [vmem:[%s1995_s2] sm:$0xff]  ;;  %252 = vmatprep.mubr.f32.mxu1 %v1555_v3  ;;  %vm184_vm4 = vcmask 523264   ;;  %vm1275_vm5 = vcmask 785408  }
   0x2   :  { %v1595_v4 = vpack.c.bf16 %v29_v1, %v27_v0  ;;  %v28_v5 = vld [vmem:[%s1995_s2 + $0x10] sm:$0xff]  ;;  %v31_v6 = vld [vmem:[%s1995_s2 + $0x28] sm:$0xff]  ;;  %v33_v7 = vld [vmem:[%s1995_s2 + $0x38] sm:$0xff]  ;;  %v18_v34 = vand.u32 127, %v17_v33 }
   0x3   :  { %v1606_v8 = vpack.c.bf16 %v28_v5, %v26_v2  ;;  %v1608_v9 = vpack.c.bf16 %v33_v7, %v31_v6  ;;  %v30_v10 = vld [vmem:[%s1995_s2 + $0x20] sm:$0xff]  ;;  %v32_v11 = vld [vmem:[%s1995_s2 + $0x30] sm:$0xff]  ;;  %v51_v13 = vld [vmem:[%s1996_s1 + $0x8] sm:$0xff] }
   0x4   :  { %v50_v12 = vld [vmem:[%s1996_s1] sm:$0xff]  ;;  %1343 = vmatprep.subr.bf16.mxu1 %v1595_v4  ;;  %v35_v14 = vld [vmem:[%s1995_s2 + $0x48] sm:$0xff]  ;;  %v37_v15 = vld [vmem:[%s1995_s2 + $0x58] sm:$0xff]  ;;  %v1630_v16 = vpack.c.bf16 %v32_v11, %v30_v10  ;;  %vm19_vm1 = vcmp.ge.s32.totalorder %v18_v34, 64  ;;  %vm20_vm2 = vcmp.lt.s32.totalorder %v18_v34, 96 }
   0x5   :  { %1345 = vmatpush1.bf16.msra.mxu1 %v1606_v8  ;;  %v1334_v17 = vpack.c.bf16 %v51_v13, %v50_v12  ;;  %v52_v18 = vld [vmem:[%s1996_s1 + $0x10] sm:$0xff]  ;;  %v1636_v19 = vpack.c.bf16 %v37_v15, %v35_v14  ;;  %v34_v20 = vld [vmem:[%s1995_s2 + $0x40] sm:$0xff]  ;;  %v53_v22 = vld [vmem:[%s1996_s1 + $0x18] sm:$0xff] }
   0x6   :  { %1347 = vmatprep.subr.bf16.mxu1 %v1608_v9  ;;  %v36_v21 = vld [vmem:[%s1995_s2 + $0x50] sm:$0xff]  ;;  %v1338_v23 = vpack.c.bf16 %v53_v22, %v52_v18  ;;  %v39_v24 = vld [vmem:[%s1995_s2 + $0x68] sm:$0xff]  ;;  %v41_v25 = vld [vmem:[%s1995_s2 + $0x78] sm:$0xff] }
   0x7   :  { %1335 = vmatprep.subr.bf16.mxu0 %v1334_v17  ;;  %v42_v26 = vld [vmem:[%s1997_s0] sm:$0xff]  ;;  %v1658_v27 = vpack.c.bf16 %v36_v21, %v34_v20  ;;  %v1661_v28 = vpack.c.bf16 %v41_v25, %v39_v24  ;;  %v40_v30 = vld [vmem:[%s1995_s2 + $0x70] sm:$0xff]  ;;  %v43_v31 = vld [vmem:[%s1997_s0 + $0x8] sm:$0xff] }
   0x8   :  { %1337 = vmatpush3.bf16.msra.mxu0 %v1334_v17  ;;  %1322 = vmatprep.mubr.msk.f32.mxu0 %vm54_vm0, %v42_v26  ;;  %v38_v29 = vld [vmem:[%s1995_s2 + $0x60] sm:$0xff]  ;;  %vm21_vm3 = vmand %vm19_vm1, %vm20_vm2  ;;  %v44_v54 = vld [vmem:[%s1997_s0 + $0x10] sm:$0xff] }
   0x9   :  { %1349 = vmatpush1.bf16.msra.mxu1 %v1630_v16  ;;  %1339 = vmatprep.subr.bf16.mxu0 %v1338_v23  ;;  %v1673_v32 = vpack.c.bf16 %v40_v30, %v38_v29  ;;  %v1703_v37 = vld [vmem:[%s1998_s3] sm:$0xff]  ;;  %v1706_v42 = vsel %vm21_vm3, 1.0, %v1556_v41  ;;  %v1709_v46 = vsel %vm21_vm3, 0.0, %v1556_v41  ;;  %v45_v55 = vld [vmem:[%s1997_s0 + $0x18] sm:$0xff]  ;;  %v47_v57 = vld [vmem:[%s1997_s0 + $0x28] sm:$0xff] }
   0xa   :  { %1351 = vmatprep.subr.bf16.mxu1 %v1636_v19  ;;  %v46_v56 = vld [vmem:[%s1997_s0 + $0x20] sm:$0xff]  ;;  %v48_v58 = vld [vmem:[%s1997_s0 + $0x30] sm:$0xff]  ;;  %v49_v59 = vld [vmem:[%s1997_s0 + $0x38] sm:$0xff] }
   0xb   :  { %v1771_v11 = vld [vmem:[%s1998_s3 + $0x8] sm:$0xff]  ;;  %s1559_s3 = smov 96  }
   0xc   :  { %1341 = vmatpush3.bf16.msra.mxu0 %v1338_v23 }
   0xd   :  { %1353 = vmatpush1.bf16.msra.mxu1 %v1658_v27  ;;  %1359 = vmatprep.subr.bf16.mxu0 %v1595_v4 }
   0xe   :  { %1355 = vmatprep.subr.bf16.mxu1 %v1661_v28 }
   0xf   :  { %1323 = vmatmul.mubr.msk.f32.vlgmr.msra.gmra.mrb[0].mxu0 %vm54_vm0, %v43_v31 }
  0x10   :  { %1361 = vmatpush1.bf16.msra.mxu0 %v1606_v8  ;;  %1325 = vmatprep.mubr.msk.f32.mxu0 %vm54_vm0, %v44_v54 }
  0x11   :  { %1357 = vmatpush1.bf16.msra.mxu1 %v1673_v32  ;;  %1363 = vmatprep.subr.bf16.mxu0 %v1608_v9 }
  0x12   :  { %1375 = vmatprep.subr.bf16.mxu1 %v1595_v4 }
  0x13   :  { %1326 = vmatmul.mubr.msk.f32.gmra.mrb[2].mxu0 %vm54_vm0, %v45_v55 }
  0x14   :  { %253 = vmatmul.mubr.f32.vlgmr.msra.gmra.mrb[0].mxu1 %v1555_v3  ;;  %1365 = vmatpush1.bf16.msra.mxu0 %v1630_v16 }
  0x15   :  { %1367 = vmatprep.subr.bf16.mxu0 %v1636_v19  ;;  %1377 = vmatpush1.bf16.msra.mxu1 %v1606_v8 }
  0x16   :  { %1379 = vmatprep.subr.bf16.mxu1 %v1608_v9  ;;  %478 = vmatprep.mubr.f32.mxu1 %v1555_v3 }
  0x17   :  { %1328 = vmatprep.mubr.msk.f32.mxu0 %vm54_vm0, %v46_v56 }
  0x18   :  { %1369 = vmatpush1.bf16.msra.mxu0 %v1658_v27 }
  0x19   :  { %1371 = vmatprep.subr.bf16.mxu0 %v1661_v28  ;;  %1381 = vmatpush1.bf16.msra.mxu1 %v1630_v16 }
  0x1a   :  { %1383 = vmatprep.subr.bf16.mxu1 %v1636_v19  ;;  %1329 = vmatmul.mubr.msk.f32.gmra.mrb[4].mxu0 %vm54_vm0, %v47_v57 }
  0x1b   :  { %1331 = vmatprep.mubr.msk.f32.mxu0 %vm54_vm0, %v48_v58 }
  0x1c   :  { %1373 = vmatpush1.bf16.msra.mxu0 %v1673_v32 }
  0x1d   :  { %1385 = vmatpush1.bf16.msra.mxu1 %v1658_v27  ;;  %1391 = vmatprep.subr.bf16.mxu0 %v1595_v4 }
  0x1e   :  { %1387 = vmatprep.subr.bf16.mxu1 %v1661_v28  ;;  %1332 = vmatmul.mubr.msk.f32.gmra.mrb[6].mxu0 %vm54_vm0, %v49_v59 }
  0x1f   :  { %352 = vmatprep.mubr.f32.mxu0 %v1555_v3 }
  0x21   :  { %1389 = vmatpush1.bf16.msra.mxu1 %v1673_v32 }
  0x22   :  { %1407 = vmatprep.subr.bf16.mxu1 %v1595_v4 }
  0xe2   :  { %v1698_v35 = vpop.f32.mrb[0].mxu0 }
  0xe3   :  { %v145_v36 = vpop.f32.mrb[1].mxu0 }
  0xe6   :  { %v1745_v63 = vpop.f32.mrb[2].mxu0 }
  0xe7   :  { %v254_v38 = vpop.f32.mrb[0].mxu1  ;;  %v1747_v0 = vpop.f32.mrb[3].mxu0 }
  0xe8   :  { %v255_v39 = vadd.f32 %v254_v38, %v1703_v37  ;;  %v256_v40 = vpop.f32.mrb[1].mxu1 }
  0xea   :  { %v258_v43 = vadd.f32 %v255_v39, %v145_v36 }
  0xec   :  { %v259_v44 = vmul.f32 %v258_v43, %v1706_v42 }
  0xed   :  { %v1749_v1 = vpop.f32.mrb[4].mxu0 }
  0xee   :  { %1491 = vtanh.f32 %v259_v44  ;;  %v1751_v2 = vpop.f32.mrb[5].mxu0 }
  0xf1   :  { %v1753_v5 = vpop.f32.mrb[6].mxu0 }
  0xf2   :  { %v1755_v6 = vpop.f32.mrb[7].mxu0 }
  0xf8   :  { %v1492_v45 = vpop.eup %1491 }
  0xf9   :  { %v261_v47 = vmul.f32 %v1492_v45, %v1706_v42 }
  0xfb   :  { %v262_v48 = vadd.f32 %v261_v47, %v1709_v46 }
  0xfd   :  { %265 = vrot.lane.b32.xlu0 %v262_v48, %s1557_s7  ;;  %v263_v51 = vmul.f32 0.0, %v262_v48 }
 0x16f   :  { %v266_v49 = vpop.permute.xlu0 %265 }
 0x170   :  { %v268_v50 = vmul.f32 %v266_v49, %v262_v48 }
 0x172   :  { %270 = vrot.lane.b32.xlu0 %v268_v50, %s1558_s8 }
 0x1e4   :  { %v271_v52 = vpop.permute.xlu0 %270 }
 0x1e5   :  { %v1715_v53 = vadd.f32 %v271_v52, %v263_v51 }
 0x1e7   :  { %1493 = vtanh.f32 %v1715_v53 }
 0x1f1   :  { %v1494_v60 = vpop.eup %1493 }
 0x1f2   :  { %276 = vrot.lane.b32.xlu1 %v1494_v60, %s1557_s7 }
 0x264   :  { %v277_v61 = vpop.permute.xlu1 %276 }
 0x265   :  { %v279_v62 = vmul.f32 %v277_v61, %v262_v48 }
 0x267   :  { %281 = vrot.lane.b32.xlu1 %v279_v62, %s1558_s8 }
 0x2d9   :  { %v282_v7 = vpop.permute.xlu1 %281 }
 0x2da   :  { %v284_v10 = vsel %vm54_vm0, %v282_v7, 0.0 }
 0x2db   :  { %1294 = vmatmul.mubr.msk.f32.vlgmr.msra.gmra.mrb[8].mxu0 %vm184_vm4, %v284_v10 }
 0x2dc   :  { %1393 = vmatpush1.bf16.msra.mxu0 %v1606_v8  ;;  %604 = vmatprep.mubr.f32.mxu0 %v1555_v3 }
 0x2dd   :  { %1395 = vmatprep.subr.bf16.mxu0 %v1608_v9 }
 0x2e0   :  { %1397 = vmatpush1.bf16.msra.mxu0 %v1630_v16 }
 0x2e1   :  { %1399 = vmatprep.subr.bf16.mxu0 %v1636_v19 }
 0x2e4   :  { %1401 = vmatpush1.bf16.msra.mxu0 %v1658_v27 }
 0x2e5   :  { %1403 = vmatprep.subr.bf16.mxu0 %v1661_v28 }
 0x2e8   :  { %1405 = vmatpush1.bf16.msra.mxu0 %v1673_v32 }
 0x2e9   :  { %1423 = vmatprep.subr.bf16.mxu0 %v1595_v4 }
 0x3ae   :  { %v354_v12 = vpop.f32.mrb[8].mxu0 }
 0x3af   :  { %v355_v13 = vadd.f32 %v354_v12, %v1703_v37  ;;  %v356_v14 = vpop.f32.mrb[9].mxu0 }
 0x3b0   :  { %v357_v15 = vadd.f32 %v356_v14, %v1771_v11 }
 0x3b1   :  { %v359_v17 = vadd.f32 %v1698_v35, %v355_v13 }
 0x3b2   :  { %v381_v18 = vmul.f32 %v357_v15, %v1706_v42 }
 0x3b3   :  { %v360_v20 = vmul.f32 %v359_v17, %v1706_v42 }
 0x3b4   :  { %1495 = vtanh.f32 %v381_v18 }
 0x3b5   :  { %1497 = vtanh.f32 %v360_v20 }
 0x3be   :  { %v1496_v21 = vpop.eup %1495 }
 0x3bf   :  { %v1498_v22 = vpop.eup %1497  ;;  %v383_v23 = vmul.f32 %v1496_v21, %v1706_v42 }
 0x3c0   :  { %v362_v24 = vmul.f32 %v1498_v22, %v1706_v42 }
 0x3c1   :  { %v384_v25 = vadd.f32 %v383_v23, %v1709_v46 }
 0x3c2   :  { %v363_v26 = vadd.f32 %v362_v24, %v1709_v46 }
 0x3c3   :  { %387 = vrot.lane.b32.xlu1 %v384_v25, %s1557_s7  ;;  %v385_v34 = vmul.f32 0.0, %v384_v25 }
 0x3c4   :  { %366 = vrot.lane.b32.xlu0 %v363_v26, %s1557_s7  ;;  %v364_v36 = vmul.f32 %v363_v26, %v1715_v53 }
 0x435   :  { %v388_v29 = vpop.permute.xlu1 %387 }
 0x436   :  { %v390_v30 = vmul.f32 %v388_v29, %v384_v25  ;;  %v367_v31 = vpop.permute.xlu0 %366 }
 0x437   :  { %v369_v33 = vmul.f32 %v367_v31, %v363_v26 }
 0x438   :  { %392 = vrot.lane.b32.xlu1 %v390_v30, %s1558_s8 }
 0x439   :  { %371 = vrot.lane.b32.xlu0 %v369_v33, %s1558_s8 }
 0x4aa   :  { %v393_v35 = vpop.permute.xlu1 %392 }
 0x4ab   :  { %v395_v38 = vadd.f32 %v393_v35, %v385_v34  ;;  %v372_v39 = vpop.permute.xlu0 %371 }
 0x4ac   :  { %v374_v40 = vadd.f32 %v372_v39, %v364_v36 }
 0x4ad   :  { %1499 = vtanh.f32 %v395_v38 }
 0x4ae   :  { %1501 = vtanh.f32 %v374_v40 }
 0x4b7   :  { %v1500_v41 = vpop.eup %1499 }
 0x4b8   :  { %v1502_v43 = vpop.eup %1501  ;;  %398 = vrot.lane.b32.xlu1 %v1500_v41, %s1557_s7 }
 0x4b9   :  { %377 = vrot.lane.b32.xlu0 %v1502_v43, %s1557_s7 }
 0x52a   :  { %v399_v44 = vpop.permute.xlu1 %398 }
 0x52b   :  { %v1789_v45 = vmul.f32 %v399_v44, %v384_v25  ;;  %v378_v47 = vpop.permute.xlu0 %377 }
 0x52c   :  { %v380_v48 = vmul.f32 %v378_v47, %v363_v26 }
 0x52d   :  { %407 = vrot.lane.b32.xlu1 %v1789_v45, %s1557_s7 }
 0x52e   :  { %403 = vrot.lane.b32.xlu0 %v380_v48, %s1558_s8 }
 0x59f   :  { %v408_v49 = vpop.permute.xlu1 %407 }
 0x5a0   :  { %v404_v50 = vpop.permute.xlu0 %403 }
 0x5a1   :  { %v410_v51 = vsel %vm54_vm0, %v404_v50, %v408_v49 }
 0x5a2   :  { %1295 = vmatmul.mubr.msk.f32.vlgmr.msra.gmra.mrb[2].mxu1 %vm184_vm4, %v410_v51 }
 0x5a3   :  { %1409 = vmatpush1.bf16.msra.mxu1 %v1606_v8  ;;  %730 = vmatprep.mubr.f32.mxu1 %v1555_v3 }
 0x5a4   :  { %1411 = vmatprep.subr.bf16.mxu1 %v1608_v9 }
 0x5a7   :  { %1413 = vmatpush1.bf16.msra.mxu1 %v1630_v16 }
 0x5a8   :  { %1415 = vmatprep.subr.bf16.mxu1 %v1636_v19 }
 0x5ab   :  { %1417 = vmatpush1.bf16.msra.mxu1 %v1658_v27 }
 0x5ac   :  { %1419 = vmatprep.subr.bf16.mxu1 %v1661_v28 }
 0x5af   :  { %1421 = vmatpush1.bf16.msra.mxu1 %v1673_v32 }
 0x5b0   :  { %1439 = vmatprep.subr.bf16.mxu1 %v1595_v4 }
 0x675   :  { %v480_v52 = vpop.f32.mrb[2].mxu1 }
 0x676   :  { %v481_v53 = vadd.f32 %v480_v52, %v1703_v37  ;;  %v482_v54 = vpop.f32.mrb[3].mxu1 }
 0x677   :  { %v483_v55 = vadd.f32 %v482_v54, %v1771_v11 }
 0x678   :  { %v485_v56 = vadd.f32 %v481_v53, %v1747_v0 }
 0x679   :  { %v507_v57 = vmul.f32 %v483_v55, %v1706_v42 }
 0x67a   :  { %v486_v58 = vmul.f32 %v485_v56, %v1706_v42 }
 0x67b   :  { %1503 = vtanh.f32 %v507_v57 }
 0x67c   :  { %1505 = vtanh.f32 %v486_v58 }
 0x685   :  { %v1504_v59 = vpop.eup %1503 }
 0x686   :  { %v1506_v60 = vpop.eup %1505  ;;  %v509_v61 = vmul.f32 %v1504_v59, %v1706_v42 }
 0x687   :  { %v488_v62 = vmul.f32 %v1506_v60, %v1706_v42 }
 0x688   :  { %v510_v7 = vadd.f32 %v509_v61, %v1709_v46 }
 0x689   :  { %v489_v10 = vadd.f32 %v488_v62, %v1709_v46 }
 0x68a   :  { %513 = vrot.lane.b32.xlu1 %v510_v7, %s1557_s7  ;;  %v511_v15 = vmul.f32 %v510_v7, %v395_v38 }
 0x68b   :  { %492 = vrot.lane.b32.xlu0 %v489_v10, %s1557_s7  ;;  %v490_v18 = vmul.f32 %v489_v10, %v374_v40 }
 0x6fc   :  { %v514_v0 = vpop.permute.xlu1 %513 }
 0x6fd   :  { %v516_v12 = vmul.f32 %v514_v0, %v510_v7  ;;  %v493_v13 = vpop.permute.xlu0 %492 }
 0x6fe   :  { %v495_v14 = vmul.f32 %v493_v13, %v489_v10 }
 0x6ff   :  { %518 = vrot.lane.b32.xlu1 %v516_v12, %s1558_s8 }
 0x700   :  { %497 = vrot.lane.b32.xlu0 %v495_v14, %s1558_s8 }
 0x771   :  { %v519_v17 = vpop.permute.xlu1 %518 }
 0x772   :  { %v521_v20 = vadd.f32 %v519_v17, %v511_v15  ;;  %v498_v21 = vpop.permute.xlu0 %497 }
 0x773   :  { %v500_v22 = vadd.f32 %v498_v21, %v490_v18 }
 0x774   :  { %1507 = vtanh.f32 %v521_v20 }
 0x775   :  { %1509 = vtanh.f32 %v500_v22 }
 0x77e   :  { %v1508_v23 = vpop.eup %1507 }
 0x77f   :  { %v1510_v24 = vpop.eup %1509  ;;  %524 = vrot.lane.b32.xlu1 %v1508_v23, %s1557_s7 }
 0x780   :  { %503 = vrot.lane.b32.xlu0 %v1510_v24, %s1557_s7 }
 0x7f1   :  { %v525_v25 = vpop.permute.xlu1 %524 }
 0x7f2   :  { %v527_v26 = vmul.f32 %v525_v25, %v510_v7  ;;  %v504_v29 = vpop.permute.xlu0 %503 }
 0x7f3   :  { %v506_v30 = vmul.f32 %v504_v29, %v489_v10 }
 0x7f4   :  { %533 = vrot.lane.b32.xlu1 %v527_v26, %s1557_s7 }
 0x7f5   :  { %529 = vrot.lane.b32.xlu0 %v506_v30, %s1558_s8 }
 0x866   :  { %v1822_v31 = vpop.permute.xlu1 %533 }
 0x867   :  { %v530_v33 = vpop.permute.xlu0 %529 }
 0x868   :  { %v536_v34 = vsel %vm54_vm0, %v530_v33, %v1822_v31 }
 0x869   :  { %1296 = vmatmul.mubr.msk.f32.vlgmr.msra.gmra.mrb[10].mxu0 %vm184_vm4, %v536_v34 }
 0x86a   :  { %1425 = vmatpush1.bf16.msra.mxu0 %v1606_v8  ;;  %856 = vmatprep.mubr.f32.mxu0 %v1555_v3 }
 0x86b   :  { %1427 = vmatprep.subr.bf16.mxu0 %v1608_v9 }
 0x86e   :  { %1429 = vmatpush1.bf16.msra.mxu0 %v1630_v16 }
 0x86f   :  { %1431 = vmatprep.subr.bf16.mxu0 %v1636_v19 }
 0x872   :  { %1433 = vmatpush1.bf16.msra.mxu0 %v1658_v27 }
 0x873   :  { %1435 = vmatprep.subr.bf16.mxu0 %v1661_v28 }
 0x876   :  { %1437 = vmatpush1.bf16.msra.mxu0 %v1673_v32 }
 0x877   :  { %1455 = vmatprep.subr.bf16.mxu0 %v1595_v4 }
 0x93c   :  { %v606_v35 = vpop.f32.mrb[10].mxu0 }
 0x93d   :  { %v607_v36 = vadd.f32 %v606_v35, %v1703_v37  ;;  %v608_v38 = vpop.f32.mrb[11].mxu0 }
 0x93e   :  { %v609_v39 = vadd.f32 %v608_v38, %v1771_v11 }
 0x93f   :  { %v611_v40 = vadd.f32 %v1745_v63, %v607_v36 }
 0x940   :  { %v633_v41 = vmul.f32 %v609_v39, %v1706_v42 }
 0x941   :  { %v612_v43 = vmul.f32 %v611_v40, %v1706_v42 }
 0x942   :  { %1511 = vtanh.f32 %v633_v41 }
 0x943   :  { %1513 = vtanh.f32 %v612_v43 }
 0x94c   :  { %v1512_v44 = vpop.eup %1511 }
 0x94d   :  { %v1514_v47 = vpop.eup %1513  ;;  %v635_v48 = vmul.f32 %v1512_v44, %v1706_v42 }
 0x94e   :  { %v614_v49 = vmul.f32 %v1514_v47, %v1706_v42 }
 0x94f   :  { %v636_v50 = vadd.f32 %v635_v48, %v1709_v46 }
 0x950   :  { %v615_v51 = vadd.f32 %v614_v49, %v1709_v46 }
 0x951   :  { %639 = vrot.lane.b32.xlu1 %v636_v50, %s1557_s7  ;;  %v637_v55 = vmul.f32 %v636_v50, %v521_v20 }
 0x952   :  { %618 = vrot.lane.b32.xlu0 %v615_v51, %s1557_s7  ;;  %v616_v57 = vmul.f32 %v615_v51, %v500_v22 }
 0x9c3   :  { %v640_v63 = vpop.permute.xlu1 %639 }
 0x9c4   :  { %v642_v52 = vmul.f32 %v640_v63, %v636_v50  ;;  %v619_v53 = vpop.permute.xlu0 %618 }
 0x9c5   :  { %v621_v54 = vmul.f32 %v619_v53, %v615_v51 }
 0x9c6   :  { %644 = vrot.lane.b32.xlu1 %v642_v52, %s1558_s8 }
 0x9c7   :  { %623 = vrot.lane.b32.xlu0 %v621_v54, %s1558_s8 }
 0xa38   :  { %v645_v56 = vpop.permute.xlu1 %644 }
 0xa39   :  { %v647_v58 = vadd.f32 %v645_v56, %v637_v55  ;;  %v624_v59 = vpop.permute.xlu0 %623 }
 0xa3a   :  { %v626_v60 = vadd.f32 %v624_v59, %v616_v57 }
 0xa3b   :  { %1515 = vtanh.f32 %v647_v58 }
 0xa3c   :  { %1517 = vtanh.f32 %v626_v60 }
 0xa45   :  { %v1516_v61 = vpop.eup %1515 }
 0xa46   :  { %v1518_v62 = vpop.eup %1517  ;;  %650 = vrot.lane.b32.xlu1 %v1516_v61, %s1557_s7 }
 0xa47   :  { %629 = vrot.lane.b32.xlu0 %v1518_v62, %s1557_s7 }
 0xab8   :  { %v651_v7 = vpop.permute.xlu1 %650 }
 0xab9   :  { %v1851_v10 = vmul.f32 %v651_v7, %v636_v50  ;;  %v630_v0 = vpop.permute.xlu0 %629 }
 0xaba   :  { %v632_v12 = vmul.f32 %v630_v0, %v615_v51 }
 0xabb   :  { %659 = vrot.lane.b32.xlu1 %v1851_v10, %s1557_s7 }
 0xabc   :  { %655 = vrot.lane.b32.xlu0 %v632_v12, %s1558_s8 }
 0xb2d   :  { %v660_v13 = vpop.permute.xlu1 %659 }
 0xb2e   :  { %v656_v14 = vpop.permute.xlu0 %655 }
 0xb2f   :  { %v662_v15 = vsel %vm54_vm0, %v656_v14, %v660_v13 }
 0xb30   :  { %1297 = vmatmul.mubr.msk.f32.vlgmr.msra.gmra.mrb[4].mxu1 %vm184_vm4, %v662_v15 }
 0xb31   :  { %1441 = vmatpush1.bf16.msra.mxu1 %v1606_v8  ;;  %982 = vmatprep.mubr.f32.mxu1 %v1555_v3 }
 0xb32   :  { %1443 = vmatprep.subr.bf16.mxu1 %v1608_v9 }
 0xb35   :  { %1445 = vmatpush1.bf16.msra.mxu1 %v1630_v16 }
 0xb36   :  { %1447 = vmatprep.subr.bf16.mxu1 %v1636_v19 }
 0xb39   :  { %1449 = vmatpush1.bf16.msra.mxu1 %v1658_v27 }
 0xb3a   :  { %1451 = vmatprep.subr.bf16.mxu1 %v1661_v28 }
 0xb3d   :  { %1453 = vmatpush1.bf16.msra.mxu1 %v1673_v32 }
 0xb3e   :  { %1471 = vmatprep.subr.bf16.mxu1 %v1595_v4 }
 0xc03   :  { %v732_v17 = vpop.f32.mrb[4].mxu1 }
 0xc04   :  { %v733_v18 = vadd.f32 %v732_v17, %v1703_v37  ;;  %v734_v20 = vpop.f32.mrb[5].mxu1 }
 0xc05   :  { %v735_v21 = vadd.f32 %v734_v20, %v1771_v11 }
 0xc06   :  { %v737_v22 = vadd.f32 %v733_v18, %v1751_v2 }
 0xc07   :  { %v759_v23 = vmul.f32 %v735_v21, %v1706_v42 }
 0xc08   :  { %v738_v24 = vmul.f32 %v737_v22, %v1706_v42 }
 0xc09   :  { %1519 = vtanh.f32 %v759_v23 }
 0xc0a   :  { %1521 = vtanh.f32 %v738_v24 }
 0xc13   :  { %v1520_v25 = vpop.eup %1519 }
 0xc14   :  { %v1522_v26 = vpop.eup %1521  ;;  %v761_v29 = vmul.f32 %v1520_v25, %v1706_v42 }
 0xc15   :  { %v740_v4 = vmul.f32 %v1522_v26, %v1706_v42 }
 0xc16   :  { %v762_v30 = vadd.f32 %v761_v29, %v1709_v46 }
 0xc17   :  { %v741_v33 = vadd.f32 %v740_v4, %v1709_v46 }
 0xc18   :  { %765 = vrot.lane.b32.xlu1 %v762_v30, %s1557_s7  ;;  %v763_v38 = vmul.f32 %v762_v30, %v647_v58 }
 0xc19   :  { %744 = vrot.lane.b32.xlu0 %v741_v33, %s1557_s7  ;;  %v742_v40 = vmul.f32 %v741_v33, %v626_v60 }
 0xc8a   :  { %v766_v2 = vpop.permute.xlu1 %765 }
 0xc8b   :  { %v768_v34 = vmul.f32 %v766_v2, %v762_v30  ;;  %v745_v35 = vpop.permute.xlu0 %744 }
 0xc8c   :  { %v747_v36 = vmul.f32 %v745_v35, %v741_v33 }
 0xc8d   :  { %770 = vrot.lane.b32.xlu1 %v768_v34, %s1558_s8 }
 0xc8e   :  { %749 = vrot.lane.b32.xlu0 %v747_v36, %s1558_s8 }
 0xcff   :  { %v771_v39 = vpop.permute.xlu1 %770 }
 0xd00   :  { %v773_v41 = vadd.f32 %v771_v39, %v763_v38  ;;  %v750_v43 = vpop.permute.xlu0 %749 }
 0xd01   :  { %v752_v44 = vadd.f32 %v750_v43, %v742_v40 }
 0xd02   :  { %1523 = vtanh.f32 %v773_v41 }
 0xd03   :  { %1525 = vtanh.f32 %v752_v44 }
 0xd0c   :  { %v1524_v47 = vpop.eup %1523 }
 0xd0d   :  { %v1526_v48 = vpop.eup %1525  ;;  %776 = vrot.lane.b32.xlu1 %v1524_v47, %s1557_s7 }
 0xd0e   :  { %755 = vrot.lane.b32.xlu0 %v1526_v48, %s1557_s7 }
 0xd7f   :  { %v777_v49 = vpop.permute.xlu1 %776 }
 0xd80   :  { %v1882_v50 = vmul.f32 %v777_v49, %v762_v30  ;;  %v756_v51 = vpop.permute.xlu0 %755 }
 0xd81   :  { %v758_v63 = vmul.f32 %v756_v51, %v741_v33 }
 0xd82   :  { %785 = vrot.lane.b32.xlu1 %v1882_v50, %s1557_s7 }
 0xd83   :  { %781 = vrot.lane.b32.xlu0 %v758_v63, %s1558_s8 }
 0xdf4   :  { %v786_v52 = vpop.permute.xlu1 %785 }
 0xdf5   :  { %v782_v53 = vpop.permute.xlu0 %781 }
 0xdf6   :  { %v788_v54 = vsel %vm54_vm0, %v782_v53, %v786_v52 }
 0xdf7   :  { %1298 = vmatmul.mubr.msk.f32.vlgmr.msra.gmra.mrb[12].mxu0 %vm184_vm4, %v788_v54 }
 0xdf8   :  { %1457 = vmatpush1.bf16.msra.mxu0 %v1606_v8  ;;  %1108 = vmatprep.mubr.f32.mxu0 %v1555_v3 }
 0xdf9   :  { %1459 = vmatprep.subr.bf16.mxu0 %v1608_v9 }
 0xdfc   :  { %1461 = vmatpush1.bf16.msra.mxu0 %v1630_v16 }
 0xdfd   :  { %1463 = vmatprep.subr.bf16.mxu0 %v1636_v19 }
 0xe00   :  { %1465 = vmatpush1.bf16.msra.mxu0 %v1658_v27 }
 0xe01   :  { %1467 = vmatprep.subr.bf16.mxu0 %v1661_v28 }
 0xe04   :  { %1469 = vmatpush1.bf16.msra.mxu0 %v1673_v32 }
 0xeca   :  { %v858_v55 = vpop.f32.mrb[12].mxu0 }
 0xecb   :  { %v859_v56 = vadd.f32 %v858_v55, %v1703_v37  ;;  %v860_v57 = vpop.f32.mrb[13].mxu0 }
 0xecc   :  { %v861_v58 = vadd.f32 %v860_v57, %v1771_v11 }
 0xecd   :  { %v863_v59 = vadd.f32 %v1749_v1, %v859_v56 }
 0xece   :  { %v885_v60 = vmul.f32 %v861_v58, %v1706_v42 }
 0xecf   :  { %v864_v61 = vmul.f32 %v863_v59, %v1706_v42 }
 0xed0   :  { %1527 = vtanh.f32 %v885_v60 }
 0xed1   :  { %1529 = vtanh.f32 %v864_v61 }
 0xeda   :  { %v1528_v62 = vpop.eup %1527 }
 0xedb   :  { %v1530_v7 = vpop.eup %1529  ;;  %v887_v0 = vmul.f32 %v1528_v62, %v1706_v42 }
 0xedc   :  { %v866_v12 = vmul.f32 %v1530_v7, %v1706_v42 }
 0xedd   :  { %v888_v13 = vadd.f32 %v887_v0, %v1709_v46 }
 0xede   :  { %v867_v14 = vadd.f32 %v866_v12, %v1709_v46 }
 0xedf   :  { %891 = vrot.lane.b32.xlu1 %v888_v13, %s1557_s7  ;;  %v889_v20 = vmul.f32 %v888_v13, %v773_v41 }
 0xee0   :  { %870 = vrot.lane.b32.xlu0 %v867_v14, %s1557_s7  ;;  %v868_v22 = vmul.f32 %v867_v14, %v752_v44 }
 0xf51   :  { %v892_v1 = vpop.permute.xlu1 %891 }
 0xf52   :  { %v894_v15 = vmul.f32 %v892_v1, %v888_v13  ;;  %v871_v17 = vpop.permute.xlu0 %870 }
 0xf53   :  { %v873_v18 = vmul.f32 %v871_v17, %v867_v14 }
 0xf54   :  { %896 = vrot.lane.b32.xlu1 %v894_v15, %s1558_s8 }
 0xf55   :  { %875 = vrot.lane.b32.xlu0 %v873_v18, %s1558_s8 }
 0xfc6   :  { %v897_v21 = vpop.permute.xlu1 %896 }
 0xfc7   :  { %v899_v23 = vadd.f32 %v897_v21, %v889_v20  ;;  %v876_v24 = vpop.permute.xlu0 %875 }
 0xfc8   :  { %v878_v25 = vadd.f32 %v876_v24, %v868_v22 }
 0xfc9   :  { %1531 = vtanh.f32 %v899_v23 }
 0xfca   :  { %1533 = vtanh.f32 %v878_v25 }
 0xfd3   :  { %v1532_v26 = vpop.eup %1531 }
 0xfd4   :  { %v1534_v29 = vpop.eup %1533  ;;  %902 = vrot.lane.b32.xlu1 %v1532_v26, %s1557_s7 }
 0xfd5   :  { %881 = vrot.lane.b32.xlu0 %v1534_v29, %s1557_s7 }
0x1046   :  { %v903_v4 = vpop.permute.xlu1 %902 }
0x1047   :  { %v1912_v30 = vmul.f32 %v903_v4, %v888_v13  ;;  %v882_v33 = vpop.permute.xlu0 %881 }
0x1048   :  { %v884_v2 = vmul.f32 %v882_v33, %v867_v14 }
0x1049   :  { %911 = vrot.lane.b32.xlu1 %v1912_v30, %s1557_s7 }
0x104a   :  { %907 = vrot.lane.b32.xlu0 %v884_v2, %s1558_s8 }
0x10bb   :  { %v912_v34 = vpop.permute.xlu1 %911 }
0x10bc   :  { %v908_v35 = vpop.permute.xlu0 %907 }
0x10bd   :  { %v914_v36 = vsel %vm54_vm0, %v908_v35, %v912_v34 }
0x10be   :  { %1299 = vmatmul.mubr.msk.f32.vlgmr.msra.gmra.mrb[6].mxu1 %vm184_vm4, %v914_v36 }
0x10bf   :  { %1473 = vmatpush1.bf16.msra.mxu1 %v1606_v8  ;;  %1234 = vmatprep.mubr.f32.mxu1 %v1555_v3 }
0x10c0   :  { %1475 = vmatprep.subr.bf16.mxu1 %v1608_v9 }
0x10c3   :  { %1477 = vmatpush1.bf16.msra.mxu1 %v1630_v16 }
0x10c4   :  { %1479 = vmatprep.subr.bf16.mxu1 %v1636_v19 }
0x10c7   :  { %1481 = vmatpush1.bf16.msra.mxu1 %v1658_v27 }
0x10c8   :  { %1483 = vmatprep.subr.bf16.mxu1 %v1661_v28 }
0x10cb   :  { %1485 = vmatpush1.bf16.msra.mxu1 %v1673_v32 }
0x1191   :  { %v984_v38 = vpop.f32.mrb[6].mxu1 }
0x1192   :  { %v985_v39 = vadd.f32 %v984_v38, %v1703_v37  ;;  %v986_v40 = vpop.f32.mrb[7].mxu1 }
0x1193   :  { %v987_v8 = vadd.f32 %v986_v40, %v1771_v11 }
0x1194   :  { %v989_v3 = vadd.f32 %v985_v39, %v1755_v6 }
0x1195   :  { %v1011_v9 = vmul.f32 %v987_v8, %v1706_v42 }
0x1196   :  { %v990_v16 = vmul.f32 %v989_v3, %v1706_v42 }
0x1197   :  { %1535 = vtanh.f32 %v1011_v9 }
0x1198   :  { %1537 = vtanh.f32 %v990_v16 }
0x11a1   :  { %v1536_v19 = vpop.eup %1535 }
0x11a2   :  { %v1538_v27 = vpop.eup %1537  ;;  %v1013_v28 = vmul.f32 %v1536_v19, %v1706_v42 }
0x11a3   :  { %v992_v32 = vmul.f32 %v1538_v27, %v1706_v42 }
0x11a4   :  { %v1014_v41 = vadd.f32 %v1013_v28, %v1709_v46 }
0x11a5   :  { %v993_v43 = vadd.f32 %v992_v32, %v1709_v46 }
0x11a6   :  { %1017 = vrot.lane.b32.xlu1 %v1014_v41, %s1557_s7  ;;  %v1015_v49 = vmul.f32 %v1014_v41, %v899_v23 }
0x11a7   :  { %996 = vrot.lane.b32.xlu0 %v993_v43, %s1557_s7  ;;  %v994_v63 = vmul.f32 %v993_v43, %v878_v25 }
0x1218   :  { %v1018_v6 = vpop.permute.xlu1 %1017 }
0x1219   :  { %v1020_v44 = vmul.f32 %v1018_v6, %v1014_v41  ;;  %v997_v47 = vpop.permute.xlu0 %996 }
0x121a   :  { %v999_v48 = vmul.f32 %v997_v47, %v993_v43 }
0x121b   :  { %1022 = vrot.lane.b32.xlu1 %v1020_v44, %s1558_s8 }
0x121c   :  { %1001 = vrot.lane.b32.xlu0 %v999_v48, %s1558_s8 }
0x128d   :  { %v1023_v51 = vpop.permute.xlu1 %1022 }
0x128e   :  { %v1025_v52 = vadd.f32 %v1023_v51, %v1015_v49  ;;  %v1002_v53 = vpop.permute.xlu0 %1001 }
0x128f   :  { %v1004_v54 = vadd.f32 %v1002_v53, %v994_v63 }
0x1290   :  { %1539 = vtanh.f32 %v1025_v52 }
0x1291   :  { %1541 = vtanh.f32 %v1004_v54 }
0x129a   :  { %v1540_v55 = vpop.eup %1539 }
0x129b   :  { %v1542_v56 = vpop.eup %1541  ;;  %1028 = vrot.lane.b32.xlu1 %v1540_v55, %s1557_s7 }
0x129c   :  { %1007 = vrot.lane.b32.xlu0 %v1542_v56, %s1557_s7 }
0x130d   :  { %v1029_v57 = vpop.permute.xlu1 %1028 }
0x130e   :  { %v1031_v58 = vmul.f32 %v1029_v57, %v1014_v41  ;;  %v1008_v59 = vpop.permute.xlu0 %1007 }
0x130f   :  { %v1010_v60 = vmul.f32 %v1008_v59, %v993_v43 }
0x1310   :  { %1037 = vrot.lane.b32.xlu1 %v1031_v58, %s1557_s7 }
0x1311   :  { %1033 = vrot.lane.b32.xlu0 %v1010_v60, %s1558_s8 }
0x1382   :  { %v1944_v61 = vpop.permute.xlu1 %1037 }
0x1383   :  { %v1034_v62 = vpop.permute.xlu0 %1033 }
0x1384   :  { %v1040_v7 = vsel %vm54_vm0, %v1034_v62, %v1944_v61 }
0x1385   :  { %1300 = vmatmul.mubr.msk.f32.vlgmr.msra.gmra.mrb[14].mxu0 %vm184_vm4, %v1040_v7 }
0x1458   :  { %v1110_v0 = vpop.f32.mrb[14].mxu0 }
0x1459   :  { %v1111_v12 = vadd.f32 %v1110_v0, %v1703_v37  ;;  %v1112_v13 = vpop.f32.mrb[15].mxu0 }
0x145a   :  { %v1113_v14 = vadd.f32 %v1112_v13, %v1771_v11 }
0x145b   :  { %v1115_v1 = vadd.f32 %v1753_v5, %v1111_v12 }
0x145c   :  { %v1137_v15 = vmul.f32 %v1113_v14, %v1706_v42 }
0x145d   :  { %v1116_v17 = vmul.f32 %v1115_v1, %v1706_v42 }
0x145e   :  { %1543 = vtanh.f32 %v1137_v15 }
0x145f   :  { %1545 = vtanh.f32 %v1116_v17 }
0x1468   :  { %v1544_v18 = vpop.eup %1543 }
0x1469   :  { %v1546_v20 = vpop.eup %1545  ;;  %v1139_v21 = vmul.f32 %v1544_v18, %v1706_v42 }
0x146a   :  { %v1118_v22 = vmul.f32 %v1546_v20, %v1706_v42 }
0x146b   :  { %v1140_v23 = vadd.f32 %v1139_v21, %v1709_v46 }
0x146c   :  { %v1119_v37 = vadd.f32 %v1118_v22, %v1709_v46 }
0x146d   :  { %1143 = vrot.lane.b32.xlu1 %v1140_v23, %s1557_s7  ;;  %v1141_v29 = vmul.f32 %v1140_v23, %v1025_v52 }
0x146e   :  { %1122 = vrot.lane.b32.xlu0 %v1119_v37, %s1557_s7  ;;  %v1120_v33 = vmul.f32 %v1119_v37, %v1004_v54 }
0x14df   :  { %v1144_v5 = vpop.permute.xlu1 %1143 }
0x14e0   :  { %v1146_v24 = vmul.f32 %v1144_v5, %v1140_v23  ;;  %v1123_v25 = vpop.permute.xlu0 %1122 }
0x14e1   :  { %v1125_v26 = vmul.f32 %v1123_v25, %v1119_v37 }
0x14e2   :  { %1148 = vrot.lane.b32.xlu1 %v1146_v24, %s1558_s8 }
0x14e3   :  { %1127 = vrot.lane.b32.xlu0 %v1125_v26, %s1558_s8 }
0x1554   :  { %v1149_v4 = vpop.permute.xlu1 %1148 }
0x1555   :  { %v1151_v2 = vadd.f32 %v1149_v4, %v1141_v29  ;;  %v1128_v34 = vpop.permute.xlu0 %1127 }
0x1556   :  { %v1130_v35 = vadd.f32 %v1128_v34, %v1120_v33 }
0x1557   :  { %1547 = vtanh.f32 %v1151_v2 }
0x1558   :  { %1549 = vtanh.f32 %v1130_v35 }
0x1561   :  { %v1548_v36 = vpop.eup %1547 }
0x1562   :  { %v1550_v38 = vpop.eup %1549  ;;  %1154 = vrot.lane.b32.xlu1 %v1548_v36, %s1557_s7 }
0x1563   :  { %1133 = vrot.lane.b32.xlu0 %v1550_v38, %s1557_s7 }
0x15d4   :  { %v1155_v39 = vpop.permute.xlu1 %1154 }
0x15d5   :  { %v1157_v40 = vmul.f32 %v1155_v39, %v1140_v23  ;;  %v1134_v8 = vpop.permute.xlu0 %1133 }
0x15d6   :  { %v1136_v3 = vmul.f32 %v1134_v8, %v1119_v37 }
0x15d7   :  { %1163 = vrot.lane.b32.xlu1 %v1157_v40, %s1557_s7 }
0x15d8   :  { %1159 = vrot.lane.b32.xlu0 %v1136_v3, %s1558_s8 }
0x1649   :  { %v1164_v9 = vpop.permute.xlu1 %1163 }
0x164a   :  { %v1160_v16 = vpop.permute.xlu0 %1159 }
0x164b   :  { %v1166_v19 = vsel %vm54_vm0, %v1160_v16, %v1164_v9 }
0x164c   :  { %1301 = vmatmul.mubr.msk.f32.vlgmr.msra.gmra.mrb[8].mxu1 %vm184_vm4, %v1166_v19 }
0x171f   :  { %v1236_v27 = vpop.f32.mrb[8].mxu1 }
0x1720   :  { %v1237_v28 = vpop.f32.mrb[9].mxu1 }
0x1721   :  { %v1238_v32 = vadd.f32 %v1237_v28, %v1771_v11 }
0x1723   :  { %v1240_v41 = vmul.f32 %v1238_v32, %v1706_v42 }
0x1725   :  { %1551 = vtanh.f32 %v1240_v41 }
0x172f   :  { %v1552_v43 = vpop.eup %1551 }
0x1730   :  { %v1242_v6 = vmul.f32 %v1552_v43, %v1706_v42 }
0x1732   :  { %v1243_v44 = vadd.f32 %v1242_v6, %v1709_v46 }
0x1734   :  { %1246 = vrot.lane.b32.xlu0 %v1243_v44, %s1557_s7  ;;  %v1244_v11 = vmul.f32 %v1243_v44, %v1151_v2 }
0x1738   :  { %1267 = vrot.lane.b32.xlu0 %v1912_v30, %s1558_s8 }
0x17a6   :  { %v1247_v47 = vpop.permute.xlu0 %1246 }
0x17a7   :  { %v1249_v48 = vmul.f32 %v1247_v47, %v1243_v44 }
0x17a9   :  { %1251 = vrot.lane.b32.xlu1 %v1249_v48, %s1558_s8 }
0x17ad   :  { %1261 = vrot.lane.b32.xlu1 %v1789_v45, %s1558_s8 }
0x17b1   :  { %1264 = vrot.lane.b32.xlu1 %v1851_v10, %s1559_s3  ;;  %v1268_v10 = vpop.permute.xlu0 %1267 }
0x17b2   :  { %v1277_v54 = vsel %vm54_vm0, %v1268_v10, %v1944_v61 }
0x181b   :  { %v1252_v49 = vpop.permute.xlu1 %1251 }
0x181c   :  { %v1254_v42 = vadd.f32 %v1252_v49, %v1244_v11 }
0x181e   :  { %1553 = vtanh.f32 %v1254_v42 }
0x181f   :  { %v1262_v46 = vpop.permute.xlu1 %1261 }
0x1820   :  { %v1273_v51 = vsel %vm54_vm0, %v1262_v46, %v1822_v31 }
0x1823   :  { %v1265_v30 = vpop.permute.xlu1 %1264 }
0x1824   :  { %v1274_v63 = vsel %vm184_vm4, %v1273_v51, %v1265_v30 }
0x1825   :  { %v1276_v52 = vsel %vm1275_vm5, %v1274_v63, %v1882_v50 }
0x1826   :  { %1280 = vst [vmem:[%s1999_s4] sm:$0xff] %v1276_v52 }
0x1828   :  { %v1554_v45 = vpop.eup %1553 }
0x1829   :  { %1257 = vrot.lane.b32.xlu0 %v1554_v45, %s1557_s7 }
0x182d   :  { %1270 = vrot.lane.b32.xlu0 %v1157_v40, %s1559_s3 }
0x189b   :  { %v1258_v53 = vpop.permute.xlu0 %1257 }
0x189c   :  { %v1260_v31 = vmul.f32 %v1258_v53, %v1243_v44 }
0x189f   :  { %v1271_v55 = vpop.permute.xlu0 %1270 }
0x18a0   :  { %v1278_v56 = vsel %vm184_vm4, %v1277_v54, %v1271_v55 }
0x18a1   :  { %v1279_v57 = vsel %vm1275_vm5, %v1278_v56, %v1260_v31 }
0x18a2   :  { %1281 = vst [vmem:[%s1999_s4 + $0x8] sm:$0xff] %v1279_v57 }

</bundles_post_ra>
